<compile_context>
chip_gen: v5e
topology: v5e:2x2
jax: 0.10.0
libtpu: 0.0.40
codegen_flags: <defaults>
</compile_context>

<pallas_src>
import functools
import math

import jax
import jax.numpy as jnp
from jax.experimental import pallas as pl
from jax.experimental.pallas import tpu as pltpu


def _round_up(x, m):
    return ((x + m - 1) // m) * m


def _vmem_capacity_bytes():
    """Per-core VMEM (v5e/v6e: 128 MiB, v7x: 64 MiB/TC); conservative fallback."""
    try:
        cap = getattr(pltpu.get_tpu_info(), "vmem_capacity_bytes", None)
        if cap:
            return int(cap)
    except Exception:
        pass
    return 64 << 20


def _const_spec(shape, index_map):
    """BlockSpec for a constant-index (grid-resident) block: 1 VMEM buffer."""
    try:
        return pl.BlockSpec(shape, index_map, pipeline_mode=pl.Buffered(1))
    except TypeError:  # older JAX without pipeline_mode -> default 2 buffers
        return pl.BlockSpec(shape, index_map)


# Contract dim 1 of both operands: x @ W^T with W kept in (out, in) layout.
_NT = (((1,), (1,)), ((), ()))


# ---------------------------------------------------------------------------
# Kernels
# ---------------------------------------------------------------------------
def _ffn_kernel_resident(x_ref, w1_ref, b1_ref, w2_ref, b2_ref, o_ref,
                         *, compute_dtype):
    # x:(tm,D)  w1,w2:(D,D) in PyTorch (out,in) layout  b1,b2:(1,D) f32
    x = x_ref[...].astype(compute_dtype)
    h = jax.lax.dot_general(x, w1_ref[...], _NT,
                            preferred_element_type=jnp.float32)
    h = jnp.maximum(h + b1_ref[...], 0.0)
    o = jax.lax.dot_general(h.astype(compute_dtype), w2_ref[...], _NT,
                            preferred_element_type=jnp.float32)
    o_ref[...] = (o + b2_ref[...]).astype(o_ref.dtype)


def _ffn_kernel_chunked(x_ref, w1_ref, b1_ref, w2_ref, b2_ref, o_ref, acc_ref,
                        *, compute_dtype):
    # Grid: (row tiles, dim_ff chunks).  Per chunk k (width tn):
    #   h_k  = relu(x @ W1[k*tn:(k+1)*tn, :]^T + b1[k*tn:(k+1)*tn])   (tm, tn)
    #   acc += h_k @ W2[:, k*tn:(k+1)*tn]^T                           (tm, D)
    k = pl.program_id(1)

    @pl.when(k == 0)
    def _():
        acc_ref[...] = jnp.zeros_like(acc_ref)

    x = x_ref[...].astype(compute_dtype)
    h = jax.lax.dot_general(x, w1_ref[...], _NT,
                            preferred_element_type=jnp.float32)
    h = jnp.maximum(h + b1_ref[...], 0.0)
    acc_ref[...] += jax.lax.dot_general(h.astype(compute_dtype), w2_ref[...],
                                        _NT, preferred_element_type=jnp.float32)

    @pl.when(k == pl.num_programs(1) - 1)
    def _():
        o_ref[...] = (acc_ref[...] + b2_ref[...]).astype(o_ref.dtype)


# ---------------------------------------------------------------------------
# Tiling
# ---------------------------------------------------------------------------
def _pick_tile_m(M, Dp, x_item):
    """Sublane-aligned row tile: >=128 rows when possible, ~8 MiB x-tile,
    and at least two grid steps for pipelining / megacore sharding."""
    if M <= 256:
        return M                         # single full-extent row block (legal)
    rows_8mib = max(8, ((8 << 20) // (Dp * x_item)) // 8 * 8)
    return max(128, min(1024, rows_8mib, (M // 2 // 8) * 8))


# ---------------------------------------------------------------------------
# Wrapper
# ---------------------------------------------------------------------------
def feed_forward_block(ffn_in, w1, b1, w2, b2, *, compute_dtype=jnp.bfloat16,
                       tile_m=None, force_chunked=False, chunk_n=None):
    """relu(ffn_in @ w1.T + b1) @ w2.T + b2 with PyTorch-layout (out,in) weights."""
    orig_shape = ffn_in.shape
    D = orig_shape[-1]
    M = math.prod(orig_shape[:-1])
    compute_dtype = jnp.dtype(compute_dtype)
    out_dtype = ffn_in.dtype

    x2 = ffn_in.reshape(M, D)

    # Pad dim_ff to a multiple of 128 (lane-dense stores, full MXU columns).
    # Zero padding is exact: padded h columns are relu(0) = 0 and contribute 0.
    Dp = _round_up(D, 128)
    if Dp != D:
        p = Dp - D
        x2 = jnp.pad(x2, ((0, 0), (0, p)))
        w1 = jnp.pad(w1, ((0, p), (0, p)))
        w2 = jnp.pad(w2, ((0, p), (0, p)))
        b1 = jnp.pad(b1, (0, p))
        b2 = jnp.pad(b2, (0, p))

    w1c = w1.astype(compute_dtype)            # (out, in) layout, no transpose
    w2c = w2.astype(compute_dtype)
    b1r = b1.reshape(1, Dp).astype(jnp.float32)
    b2r = b2.reshape(1, Dp).astype(jnp.float32)

    x_item = jnp.dtype(out_dtype).itemsize
    w_item = compute_dtype.itemsize

    # ---- row tile -----------------------------------------------------------
    if tile_m is not None:
        tm = max(1, min(int(tile_m), M))
        if tm < M:
            tm = max(8, (tm // 8) * 8)
    else:
        tm = _pick_tile_m(M, Dp, x_item)
    grid_m = pl.cdiv(M, tm)
    # Prefer an even grid length so dimension_semantics=('parallel',) splits
    # evenly across v7x's two TensorCores (no effect on v5e/v6e).
    if tile_m is None and grid_m > 1 and grid_m % 2 == 1:
        tm_alt = _round_up(pl.cdiv(M, grid_m + 1), 8)
        if tm_alt >= 8:
            tm = tm_alt
            grid_m = pl.cdiv(M, tm)

    # ---- generation-aware VMEM accounting ----------------------------------
    budget = int(_vmem_capacity_bytes() * 0.82)   # headroom for internal scratch

    def _resident_bytes(tm_):
        return (2 * Dp * Dp * w_item              # W1 + W2 (single-buffered)
                + 4 * Dp * 4                      # biases
                + 4 * tm_ * Dp * x_item           # x + out tiles (double-buffered)
                + tm_ * Dp * (8 + w_item))        # f32 h/o temporaries + cast x

    def _chunked_bytes(tm_, tn_):
        return (4 * Dp * tn_ * w_item             # W1/W2 chunks (double-buffered)
                + 4 * tn_ * 4 + 2 * Dp * 4        # bias chunk + b2
                + 4 * tm_ * Dp * x_item           # x + out tiles
                + tm_ * Dp * (4 + w_item)         # f32 accumulator + cast x
                + tm_ * tn_ * (4 + w_item))       # h chunk + cast

    use_resident = (not force_chunked) and _resident_bytes(tm) <= budget

    if use_resident:
        need = _resident_bytes(tm)
        vmem_limit = int(min(budget, int(need * 1.4) + (8 << 20)))
        kern = functools.partial(_ffn_kernel_resident,
                                 compute_dtype=compute_dtype)
        out2 = pl.pallas_call(
            kern,
            out_shape=jax.ShapeDtypeStruct((M, Dp), out_dtype),
            grid=(grid_m,),
            in_specs=[
                pl.BlockSpec((tm, Dp), lambda i: (i, 0)),      # x row tile
                _const_spec((Dp, Dp), lambda i: (0, 0)),       # W1 (resident)
                _const_spec((1, Dp), lambda i: (0, 0)),        # b1
                _const_spec((Dp, Dp), lambda i: (0, 0)),       # W2 (resident)
                _const_spec((1, Dp), lambda i: (0, 0)),        # b2
            ],
            out_specs=pl.BlockSpec((tm, Dp), lambda i: (i, 0)),
            compiler_params=pltpu.CompilerParams(
                dimension_semantics=("parallel",),
                vmem_limit_bytes=vmem_limit),
        )(x2, w1c, b1r, w2c, b2r)
    else:
        # dim_ff-chunked fallback: stream weight chunks, accumulate in VMEM.
        if chunk_n is not None:
            tn = int(chunk_n)
        else:
            q = Dp // 128
            tn = 128
            for d in range(q, 0, -1):
                if q % d:
                    continue
                if _chunked_bytes(tm, 128 * d) <= budget:
                    tn = 128 * d
                    break
        n_k = pl.cdiv(Dp, tn)
        need = _chunked_bytes(tm, tn)
        vmem_limit = int(min(budget, int(need * 1.4) + (8 << 20)))
        kern = functools.partial(_ffn_kernel_chunked,
                                 compute_dtype=compute_dtype)
        out2 = pl.pallas_call(
            kern,
            out_shape=jax.ShapeDtypeStruct((M, Dp), out_dtype),
            grid=(grid_m, n_k),
            in_specs=[
                pl.BlockSpec((tm, Dp), lambda i, k: (i, 0)),   # x row tile
                pl.BlockSpec((tn, Dp), lambda i, k: (k, 0)),   # W1 row chunk
                pl.BlockSpec((1, tn), lambda i, k: (0, k)),    # b1 chunk
                pl.BlockSpec((Dp, tn), lambda i, k: (0, k)),   # W2 col chunk
                _const_spec((1, Dp), lambda i, k: (0, 0)),     # b2
            ],
            out_specs=pl.BlockSpec((tm, Dp), lambda i, k: (i, 0)),
            scratch_shapes=[pltpu.VMEM((tm, Dp), jnp.float32)],
            compiler_params=pltpu.CompilerParams(
                dimension_semantics=("parallel", "arbitrary"),
                vmem_limit_bytes=vmem_limit),
        )(x2, w1c, b1r, w2c, b2r)

    if Dp != D:
        out2 = out2[:, :D]
    return out2.reshape(orig_shape)


# ---------------------------------------------------------------------------
# Pure-JAX reference
# ---------------------------------------------------------------------------
def _reference(x, w1, b1, w2, b2):
    hi = jax.lax.Precision.HIGHEST
    h = jnp.maximum(jnp.dot(x, w1.T, precision=hi) + b1, 0.0)
    return jnp.dot(h, w2.T, precision=hi) + b2


if __name__ == "__main__":
    # Shapes consistent with the module: ffn_in is (seq, batch, dim_ff)
    dim_ff, seq, batch = 32, 8, 2

    key = jax.random.PRNGKey(0)
    kx, k1, k2, k3, k4 = jax.random.split(key, 5)

    ffn_in = jax.random.normal(kx, (seq, batch, dim_ff), dtype=jnp.float32)
    bound = 1.0 / math.sqrt(dim_ff)                # nn.Linear default init range
    w1 = jax.random.uniform(k1, (dim_ff, dim_ff), jnp.float32, -bound, bound)
    b1 = jax.random.uniform(k2, (dim_ff,), jnp.float32, -bound, bound)
    w2 = jax.random.uniform(k3, (dim_ff, dim_ff), jnp.float32, -bound, bound)
    b2 = jax.random.uniform(k4, (dim_ff,), jnp.float32, -bound, bound)

    ref = _reference(ffn_in, w1, b1, w2, b2)

    # Default path: bf16 MXU matmuls, f32 accumulation (weight-resident).
    out = jax.block_until_ready(feed_forward_block(ffn_in, w1, b1, w2, b2))
    assert out.shape == ffn_in.shape
    assert jnp.allclose(out, ref, atol=3e-2, rtol=3e-2), "bf16 path mismatch"

    # Exact f32 path.
    out32 = jax.block_until_ready(
        feed_forward_block(ffn_in, w1, b1, w2, b2, compute_dtype=jnp.float32))
    assert jnp.allclose(out32, ref, atol=1e-4, rtol=1e-4), "f32 path mismatch"

    # dim_ff-chunked (weight-streaming) path, exercised at a small shape.
    dim2 = 256
    bnd2 = 1.0 / math.sqrt(dim2)
    x_b = jax.random.normal(kx, (4, 8, dim2), dtype=jnp.float32)
    w1b = jax.random.uniform(k1, (dim2, dim2), jnp.float32, -bnd2, bnd2)
    b1b = jax.random.uniform(k2, (dim2,), jnp.float32, -bnd2, bnd2)
    w2b = jax.random.uniform(k3, (dim2, dim2), jnp.float32, -bnd2, bnd2)
    b2b = jax.random.uniform(k4, (dim2,), jnp.float32, -bnd2, bnd2)
    ref2 = _reference(x_b, w1b, b1b, w2b, b2b)
    out2 = jax.block_until_ready(
        feed_forward_block(x_b, w1b, b1b, w2b, b2b, compute_dtype=jnp.float32,
                           force_chunked=True, chunk_n=128))
    assert jnp.allclose(out2, ref2, atol=5e-3, rtol=5e-3), "chunked path mismatch"

    print("KERNEL_OK")
</pallas_src>

<mosaic_0001>
module attributes {stable_mosaic.version = 11 : i64} {
  func.func @_ffn_kernel_resident(%arg0: i32, %arg1: memref<16x128xf32, #tpu.memory_space<vmem>>, %arg2: memref<128x128xbf16, #tpu.memory_space<vmem>>, %arg3: memref<1x128xf32, #tpu.memory_space<vmem>>, %arg4: memref<128x128xbf16, #tpu.memory_space<vmem>>, %arg5: memref<1x128xf32, #tpu.memory_space<vmem>>, %arg6: memref<16x128xf32, #tpu.memory_space<vmem>>) attributes {dimension_semantics = [#tpu.dimension_semantics<parallel>], iteration_bounds = array<i64: 1>, scalar_prefetch = 0 : i64, scratch_operands = 0 : i64, tpu.core_type = #tpu.core_type<tc>, window_params = [{transform_indices = @transform_0, window_bounds = array<i64: 16, 128>}, {pipeline_mode = #tpu.pipeline_mode<synchronous>, transform_indices = @transform_1, window_bounds = array<i64: 128, 128>}, {pipeline_mode = #tpu.pipeline_mode<synchronous>, transform_indices = @transform_2, window_bounds = array<i64: 1, 128>}, {pipeline_mode = #tpu.pipeline_mode<synchronous>, transform_indices = @transform_3, window_bounds = array<i64: 128, 128>}, {pipeline_mode = #tpu.pipeline_mode<synchronous>, transform_indices = @transform_4, window_bounds = array<i64: 1, 128>}, {transform_indices = @transform_5, window_bounds = array<i64: 16, 128>}]} {
    %c0 = arith.constant 0 : index
    %c0_0 = arith.constant 0 : index
    %0 = vector.load %arg1[%c0, %c0_0] : memref<16x128xf32, #tpu.memory_space<vmem>>, vector<16x128xf32>
    %1 = arith.truncf %0 : vector<16x128xf32> to vector<16x128xbf16>
    %c0_1 = arith.constant 0 : index
    %c0_2 = arith.constant 0 : index
    %2 = vector.load %arg2[%c0_1, %c0_2] : memref<128x128xbf16, #tpu.memory_space<vmem>>, vector<128x128xbf16>
    %cst = arith.constant dense<0.000000e+00> : vector<16x128xf32>
    %3 = tpu.matmul %1, %2, %cst {dimension_numbers = #tpu.dot_dimension_numbers<[1], [1], [0], [0], [0, 0, 1, 0], [], []>} : vector<16x128xbf16>, vector<128x128xbf16>, vector<16x128xf32> -> vector<16x128xf32>
    %c0_3 = arith.constant 0 : index
    %c0_4 = arith.constant 0 : index
    %4 = vector.load %arg3[%c0_3, %c0_4] : memref<1x128xf32, #tpu.memory_space<vmem>>, vector<1x128xf32>
    %5 = vector.broadcast %4 : vector<1x128xf32> to vector<16x128xf32>
    %6 = arith.addf %3, %5 : vector<16x128xf32>
    %cst_5 = arith.constant 0.000000e+00 : f32
    %7 = vector.broadcast %cst_5 : f32 to vector<16x128xf32>
    %8 = arith.maximumf %6, %7 : vector<16x128xf32>
    %9 = arith.truncf %8 : vector<16x128xf32> to vector<16x128xbf16>
    %c0_6 = arith.constant 0 : index
    %c0_7 = arith.constant 0 : index
    %10 = vector.load %arg4[%c0_6, %c0_7] : memref<128x128xbf16, #tpu.memory_space<vmem>>, vector<128x128xbf16>
    %cst_8 = arith.constant dense<0.000000e+00> : vector<16x128xf32>
    %11 = tpu.matmul %9, %10, %cst_8 {dimension_numbers = #tpu.dot_dimension_numbers<[1], [1], [0], [0], [0, 0, 1, 0], [], []>} : vector<16x128xbf16>, vector<128x128xbf16>, vector<16x128xf32> -> vector<16x128xf32>
    %c0_9 = arith.constant 0 : index
    %c0_10 = arith.constant 0 : index
    %12 = vector.load %arg5[%c0_9, %c0_10] : memref<1x128xf32, #tpu.memory_space<vmem>>, vector<1x128xf32>
    %13 = vector.broadcast %12 : vector<1x128xf32> to vector<16x128xf32>
    %14 = arith.addf %11, %13 : vector<16x128xf32>
    %c0_11 = arith.constant 0 : index
    %c0_12 = arith.constant 0 : index
    %15 = vector.load %arg6[%c0_11, %c0_12] : memref<16x128xf32, #tpu.memory_space<vmem>>, vector<16x128xf32>
    tpu.vector_store %arg6[%c0_11, %c0_12], %14 {strides = array<i32>} : memref<16x128xf32, #tpu.memory_space<vmem>>, vector<16x128xf32>,
    return
  }
  func.func @transform_0(%arg0: i32) -> (i32, i32) {
    %c0_i32 = arith.constant 0 : i32
    %c0_i32_0 = arith.constant 0 : i32
    return %arg0, %c0_i32 : i32, i32
  }
  func.func @transform_1(%arg0: i32) -> (i32, i32) {
    %c0_i32 = arith.constant 0 : i32
    %c0_i32_0 = arith.constant 0 : i32
    %c0_i32_1 = arith.constant 0 : i32
    return %c0_i32, %c0_i32_0 : i32, i32
  }
  func.func @transform_2(%arg0: i32) -> (i32, i32) {
    %c0_i32 = arith.constant 0 : i32
    %c0_i32_0 = arith.constant 0 : i32
    %c0_i32_1 = arith.constant 0 : i32
    return %c0_i32, %c0_i32_0 : i32, i32
  }
  func.func @transform_3(%arg0: i32) -> (i32, i32) {
    %c0_i32 = arith.constant 0 : i32
    %c0_i32_0 = arith.constant 0 : i32
    %c0_i32_1 = arith.constant 0 : i32
    return %c0_i32, %c0_i32_0 : i32, i32
  }
  func.func @transform_4(%arg0: i32) -> (i32, i32) {
    %c0_i32 = arith.constant 0 : i32
    %c0_i32_0 = arith.constant 0 : i32
    %c0_i32_1 = arith.constant 0 : i32
    return %c0_i32, %c0_i32_0 : i32, i32
  }
  func.func @transform_5(%arg0: i32) -> (i32, i32) {
    %c0_i32 = arith.constant 0 : i32
    %c0_i32_0 = arith.constant 0 : i32
    return %arg0, %c0_i32 : i32, i32
  }
}

</mosaic_0001>

<bundles_post_ra>
// kernel: tpu_custom_call.1
= control target key start
LH: loop header
LB: loop body
LE: loop exit
PB: predicated region body
PF: predicated region fallthrough
CT: control target
= control target key end

     0   :  { %10 = vsyncpa [#allocation3], 0  ;;  %s514_s0 = inlined_call_operand.hbm [shape: f32[16,128], index: 0, kind: input, shape index: {}]   ;;  %s515_s1 = inlined_call_operand.hbm [shape: bf16[128,128], index: 1, kind: input, shape index: {}]   ;;  %s516_s2 = inlined_call_operand.vmem [shape: f32[1,128], index: 2, kind: input, shape index: {}]   ;;  %s517_s3 = inlined_call_operand.hbm [shape: bf16[128,128], index: 3, kind: input, shape index: {}]   ;;  %s518_s4 = inlined_call_operand.vmem [shape: f32[1,128], index: 4, kind: input, shape index: {}]   ;;  %s519_s5 = inlined_call_operand.hbm [shape: f32[16,128], index: 5, kind: output, shape index: {}]  }
   0x1   :  { %11 = vsyncpa [#allocation6], 0  ;;  %s30_s20 = sshll.u32 %s515_s1, 4  ;;  %s31_s20 = int_to_ptr.hbm [resolvable:$true] %s30_s20 }
   0x2   :  { %12 = vsyncpa [#allocation4], 0  ;;  %s452_s21 = smov [#allocation5]   ;;  %s17_s25 = sshll.u32 %s514_s0, 4  ;;  %s18_s25 = int_to_ptr.hbm [resolvable:$true] %s17_s25 }
   0x3   :  { %s32_s22 = sshll.u32 %s452_s21, 4  ;;  %s453_s26 = smov 64   ;;  %s33_s22 = int_to_ptr.vmem [resolvable:$true] %s32_s22 }
   0x4   :  { %s454_s27 = smov 4   ;;  %s455_s28 = smov [#allocation2]  }
   0x5   :  { %38 = dma.hbm_to_vmem [thread:$0]  %s31_s20, 1024, %s33_s22, [#allocation6], %s453_s26, %s453_s26, %s454_s27  }
   0x6   :  { %s19_s29 = sshll.u32 %s455_s28, 4  ;;  %s456_s30 = smov 128   ;;  %s20_s29 = int_to_ptr.vmem [resolvable:$true] %s19_s29 }
   0x7   :  { %s457_s6 = smov 8   ;;  %s45_s8 = sshll.u32 %s517_s3, 4  ;;  %s46_s8 = int_to_ptr.hbm [resolvable:$true] %s45_s8 }
   0x8   :  { %25 = dma.hbm_to_vmem [thread:$0]  %s18_s25, 256, %s20_s29, [#allocation3], %s456_s30, %s456_s30, %s457_s6  }
   0x9   :  { %s458_s9 = smov [#allocation7]  }
   0xa   :  { %s47_s0 = sshll.u32 %s458_s9, 4  ;;  %s48_s0 = int_to_ptr.vmem [resolvable:$true] %s47_s0 }
   0xb   :  { %53 = dma.hbm_to_vmem [thread:$0]  %s46_s8, 1024, %s48_s0, [#allocation6], %s453_s26, %s453_s26, %s454_s27  }
   0xc   :  { %446 = dma.done.wait [#allocation3], 256  }
   0xd   :  { %447 = vsyncadd [#allocation3], 4294967040 }
   0xe   :  { %448 = dma.done.wait [#allocation6], 2048  }
   0xf   :  { %449 = vsyncadd [#allocation6], 4294965248  ;;  %v331_v0 = vld [vmem:[#allocation5 + $0x38] sm:$0xff]  ;;  %v330_v1 = vld [vmem:[#allocation5 + $0x30] sm:$0xff]  ;;  %s459_s13 = smov [#allocation8]  }
  0x10   :  { %139 = vmatpush.bf16.xpose.msra.mxu0 %v331_v0  ;;  %v329_v2 = vld [vmem:[#allocation5 + $0x28] sm:$0xff]  ;;  %v328_v3 = vld [vmem:[#allocation5 + $0x20] sm:$0xff]  ;;  %v327_v4 = vld [vmem:[#allocation5 + $0x18] sm:$0xff]  ;;  %s244_s14 = sshll.u32 %s459_s13, 4  ;;  %s245_s14 = int_to_ptr.vmem [resolvable:$true] %s244_s14 }
  0x11   :  { %v339_v5 = vld [vmem:[#allocation7 + $0x38] sm:$0xff]  ;;  %v326_v6 = vld [vmem:[#allocation5 + $0x10] sm:$0xff]  ;;  %v325_v8 = vld [vmem:[#allocation5 + $0x8] sm:$0xff] }
  0x12   :  { %224 = vmatpush.bf16.xpose.msra.mxu1 %v339_v5  ;;  %v338_v7 = vld [vmem:[#allocation7 + $0x30] sm:$0xff]  ;;  %v337_v9 = vld [vmem:[#allocation7 + $0x28] sm:$0xff]  ;;  %v324_v10 = vld [vmem:[#allocation5] sm:$0xff] }
  0x13   :  { %v336_v11 = vld [vmem:[#allocation7 + $0x20] sm:$0xff]  ;;  %v68_v12 = vld [vmem:[#allocation2] sm:$0xff]  ;;  %v69_v13 = vld [vmem:[#allocation2 + $0x8] sm:$0xff] }
  0x14   :  { %v70_v14 = vpack.c.bf16 %v69_v13, %v68_v12  ;;  %v335_v15 = vld [vmem:[#allocation7 + $0x18] sm:$0xff]  ;;  %v334_v16 = vld [vmem:[#allocation7 + $0x10] sm:$0xff]  ;;  %v333_v17 = vld [vmem:[#allocation7 + $0x8] sm:$0xff] }
  0x15   :  { %v332_v18 = vld [vmem:[#allocation7] sm:$0xff]  ;;  %v348_v20 = vld [vmem:[%s516_s2] ss:$0 sm:$0xff]  ;;  %s246_s2 = sshll.u32 %s519_s5, 4  ;;  %s247_s2 = int_to_ptr.hbm [resolvable:$true] %s246_s2 }
  0x16   :  { %v349_v27 = vld [vmem:[%s518_s4] ss:$0 sm:$0xff] }
  0x18   :  { %140 = vmatpush.bf16.xpose.msra.mxu0 %v330_v1 }
  0x1a   :  { %225 = vmatpush.bf16.xpose.msra.mxu1 %v338_v7 }
  0x20   :  { %141 = vmatpush.bf16.xpose.msra.mxu0 %v329_v2 }
  0x22   :  { %226 = vmatpush.bf16.xpose.msra.mxu1 %v337_v9 }
  0x28   :  { %142 = vmatpush.bf16.xpose.msra.mxu0 %v328_v3 }
  0x2a   :  { %227 = vmatpush.bf16.xpose.msra.mxu1 %v336_v11 }
  0x30   :  { %143 = vmatpush.bf16.xpose.msra.mxu0 %v327_v4 }
  0x32   :  { %228 = vmatpush.bf16.xpose.msra.mxu1 %v335_v15 }
  0x38   :  { %144 = vmatpush.bf16.xpose.msra.mxu0 %v326_v6 }
  0x3a   :  { %229 = vmatpush.bf16.xpose.msra.mxu1 %v334_v16 }
  0x40   :  { %145 = vmatpush.bf16.xpose.msra.mxu0 %v325_v8 }
  0x42   :  { %230 = vmatpush.bf16.xpose.msra.mxu1 %v333_v17 }
  0x48   :  { %146 = vmatpush.bf16.xpose.msra.mxu0 %v324_v10 }
  0x4a   :  { %231 = vmatpush.bf16.xpose.msra.mxu1 %v332_v18 }
  0x4f   :  { %147 = vmatmul.bf16.vlgmr.msra.gmra.mxu0 %v70_v14 }
  0xcc   :  { %v148_v19 = vpop.f32.mrf.mxu0 }
  0xcd   :  { %v149_v21 = vadd.f32 %v348_v20, %v148_v19 }
  0xcf   :  { %v153_v24 = vmax.f32 %v149_v21, 0.0 }
  0xd4   :  { %v150_v22 = vpop.f32.mrf.mxu0 }
  0xd5   :  { %v151_v23 = vadd.f32 %v348_v20, %v150_v22 }
  0xd7   :  { %v154_v25 = vmax.f32 %v151_v23, 0.0 }
  0xd9   :  { %v155_v26 = vpack.c.bf16 %v154_v25, %v153_v24 }
  0xdb   :  { %232 = vmatmul.bf16.vlgmr.msra.gmra.mxu1 %v155_v26 }
 0x158   :  { %v233_v28 = vpop.f32.mrf.mxu1 }
 0x159   :  { %v234_v29 = vadd.f32 %v349_v27, %v233_v28 }
 0x15b   :  { %238 = vst [vmem:[#allocation8] sm:$0xff] %v234_v29 }
 0x160   :  { %v235_v30 = vpop.f32.mrf.mxu1 }
 0x161   :  { %v236_v31 = vadd.f32 %v349_v27, %v235_v30 }
 0x163   :  { %239 = vst [vmem:[#allocation8 + $0x8] sm:$0xff] %v236_v31 }
 0x164   :  { %252 = dma.vmem_to_hbm [thread:$0]  %s245_s14, 256, %s247_s2, [#allocation4], %s456_s30, %s456_s30, %s457_s6  }
 0x165   :  { %450 = dma.done.wait [#allocation4], 256  }
 0x166   :  { %451 = vsyncadd [#allocation4], 4294967040 }
 0x167   :  { %257 = vsyncpa [#allocation3], 1 }
 0x168   :  { %258 = vsyncpa [#allocation6], 1 }
 0x169   :  { %259 = vsyncpa [#allocation4], 1 }

</bundles_post_ra>
